<compile_context>
chip_gen: v7x
topology: tpu7x:2x2x1
jax: 0.10.0
libtpu: 0.0.40
codegen_flags: <defaults>
</compile_context>

<pallas_src>
import functools

import jax
import jax.numpy as jnp
from jax import lax
from jax.experimental import pallas as pl
from jax.experimental.pallas import tpu as pltpu

_LANES = 128
# Per-input block byte budgets (dtype-aware tiling is derived from these).
_BYTE_BUDGET_REDUCE = 4 * 1024 * 1024   # mean/sum: 2 arrays x 2 bufs x 4 MiB = 16 MiB
_BYTE_BUDGET_ELEMWISE = 2 * 1024 * 1024  # 'none':  3 arrays x 2 bufs x 2 MiB = 12 MiB
_VMEM_LIMIT_BYTES = 32 * 1024 * 1024     # fits v5e/v6e (128 MiB) and v7x (64 MiB) physical
# Below this element count, plain JAX (fused by XLA) beats a 1-2 step grid.
_MIN_PALLAS_ELEMS = 16384


# ----------------------------- kernels ------------------------------------ #

def _mse_partial_kernel(pred_ref, tgt_ref, part_ref, *, tile_rows, total_rows,
                        needs_mask):
    """Per-block partial sums of (pred - tgt)^2, reduced to one (8, 128) tile."""
    d = pred_ref[...].astype(jnp.float32) - tgt_ref[...].astype(jnp.float32)
    sq = d * d

    if needs_mask:
        pid = pl.program_id(0)
        last = pl.num_programs(0) - 1

        # Fast path: every block except the last stores the unmasked reduce.
        @pl.when(pid != last)
        def _():
            part_ref[...] = sq.reshape(-1, 8, _LANES).sum(axis=0)

        # Only the last (partial) block pays for iota + compare + select.
        @pl.when(pid == last)
        def _():
            valid = total_rows - pid * tile_rows  # scalar-unit arithmetic
            row = lax.broadcasted_iota(jnp.int32, sq.shape, 0)
            masked = jnp.where(row < valid, sq, jnp.float32(0.0))
            part_ref[...] = masked.reshape(-1, 8, _LANES).sum(axis=0)
    else:
        # Pure-VPU reduction: (tile_rows,128) -> (tile_rows//8,8,128) -> (8,128).
        part_ref[...] = sq.reshape(-1, 8, _LANES).sum(axis=0)


def _mse_elementwise_kernel(pred_ref, tgt_ref, out_ref, *, scale):
    """out = scale * (pred - tgt)^2 elementwise (reduction='none')."""
    d = pred_ref[...].astype(jnp.float32) - tgt_ref[...].astype(jnp.float32)
    out_ref[...] = (jnp.float32(scale) * (d * d)).astype(out_ref.dtype)


# ----------------------------- wrapper ------------------------------------ #

def _to_slab(x):
    """Flatten to a lane-dense (rows, 128) slab; pads only if n % 128 != 0."""
    flat = x.reshape(-1)
    n = flat.shape[0]
    rem = n % _LANES
    if rem:
        # Rare path: costs one full-array copy.
        # TODO(synk): avoid with in-kernel lane masking for ragged sizes.
        flat = jnp.pad(flat, (0, _LANES - rem))
    return flat.reshape(-1, _LANES)


def _round8_up(x):
    return ((int(x) + 7) // 8) * 8


def _pick_tile_rows(rows, itemsize, byte_budget):
    """Dtype-aware block rows.

    tile_rows = min(byte_budget // (128 * itemsize)  (rounded down to mult of 8),
                    round8(cdiv(rows, 4)))            # keep >= 4 grid steps
    clamped to [8, round8(rows)].
    """
    budget_rows = max(8, (byte_budget // (_LANES * itemsize)) // 8 * 8)
    quarter_rows = max(8, _round8_up(-(-rows // 4)))      # round8(cdiv(rows, 4))
    tile = min(budget_rows, quarter_rows)
    tile = min(tile, max(8, _round8_up(rows)))
    return int(tile)


def _mse_loss_jax_small(pred, target, loss_weight, reduction):
    """Plain-JAX fast path for tiny inputs (XLA fuses this optimally)."""
    d = pred.astype(jnp.float32) - target.astype(jnp.float32)
    sq = d * d
    if reduction == "none":
        return (jnp.float32(loss_weight) * sq).astype(pred.dtype)
    total = jnp.sum(sq, dtype=jnp.float32)
    if reduction == "mean":
        total = total / jnp.float32(pred.size)
    return (jnp.float32(loss_weight) * total).astype(pred.dtype)


def mse_loss_pallas(pred, target, weight=None, loss_weight=1.0, reduction="mean"):
    """Pallas implementation of MSELoss.forward (pred/target of equal shape)."""
    if reduction not in ("none", "mean", "sum"):
        raise ValueError(f"Unsupported reduction mode: {reduction}")
    if weight is not None:
        # TODO(synk): element-wise weight path not implemented (module default is None).
        raise NotImplementedError("element-wise weight not supported in this kernel")
    assert pred.shape == target.shape
    assert pred.dtype == target.dtype

    n_elems = int(pred.size)
    if n_elems == 0:
        if reduction == "none":
            return jnp.zeros(pred.shape, dtype=pred.dtype)
        if reduction == "sum":
            return jnp.zeros((), dtype=pred.dtype)
        return jnp.full((), jnp.nan, dtype=pred.dtype)  # PyTorch: mean of empty -> NaN

    # Small-input fast path: a 1-2 step grid cannot pipeline and pallas_call
    # fixed overhead dominates; XLA fuses the tiny elementwise+reduce fine.
    if n_elems < _MIN_PALLAS_ELEMS:
        return _mse_loss_jax_small(pred, target, loss_weight, reduction)

    itemsize = int(jnp.dtype(pred.dtype).itemsize)
    p2d = _to_slab(pred)
    t2d = _to_slab(target)
    rows = p2d.shape[0]
    in_bytes = 2 * n_elems * itemsize

    compiler_params = pltpu.CompilerParams(
        dimension_semantics=("parallel",),
        vmem_limit_bytes=_VMEM_LIMIT_BYTES,
    )

    if reduction == "none":
        tile_rows = _pick_tile_rows(rows, itemsize, _BYTE_BUDGET_ELEMWISE)
        num_blocks = int(pl.cdiv(rows, tile_rows))
        in_specs = [
            pl.BlockSpec((tile_rows, _LANES), lambda i: (i, 0)),
            pl.BlockSpec((tile_rows, _LANES), lambda i: (i, 0)),
        ]
        cost = pl.CostEstimate(
            flops=3 * n_elems,
            transcendentals=0,
            bytes_accessed=in_bytes + n_elems * itemsize,
        )
        out2d = pl.pallas_call(
            functools.partial(_mse_elementwise_kernel, scale=float(loss_weight)),
            out_shape=jax.ShapeDtypeStruct((rows, _LANES), pred.dtype),
            grid_spec=pltpu.PrefetchScalarGridSpec(
                num_scalar_prefetch=0,
                grid=(num_blocks,),
                in_specs=in_specs,
                out_specs=pl.BlockSpec((tile_rows, _LANES), lambda i: (i, 0)),
            ),
            compiler_params=compiler_params,
            cost_estimate=cost,
        )(p2d, t2d)
        if rows * _LANES == n_elems:
            return out2d.reshape(pred.shape)      # common case: no pad, no slice copy
        return out2d.reshape(-1)[:n_elems].reshape(pred.shape)

    # 'mean' or 'sum': per-block lane-dense partial sums, final reduce in JAX
    # (keeps the grid fully 'parallel' -> both TensorCores on v7x).
    tile_rows = _pick_tile_rows(rows, itemsize, _BYTE_BUDGET_REDUCE)
    num_blocks = int(pl.cdiv(rows, tile_rows))
    needs_mask = (rows % tile_rows) != 0
    in_specs = [
        pl.BlockSpec((tile_rows, _LANES), lambda i: (i, 0)),
        pl.BlockSpec((tile_rows, _LANES), lambda i: (i, 0)),
    ]
    cost = pl.CostEstimate(
        flops=3 * n_elems,
        transcendentals=0,
        bytes_accessed=in_bytes + num_blocks * 8 * _LANES * 4,
    )
    partials = pl.pallas_call(
        functools.partial(_mse_partial_kernel, tile_rows=tile_rows,
                          total_rows=rows, needs_mask=needs_mask),
        out_shape=jax.ShapeDtypeStruct((num_blocks * 8, _LANES), jnp.float32),
        grid_spec=pltpu.PrefetchScalarGridSpec(
            num_scalar_prefetch=0,
            grid=(num_blocks,),
            in_specs=in_specs,
            out_specs=pl.BlockSpec((8, _LANES), lambda i: (i, 0)),
        ),
        compiler_params=compiler_params,
        cost_estimate=cost,
    )(p2d, t2d)

    total = jnp.sum(partials, dtype=jnp.float32)
    if reduction == "mean":
        total = total / jnp.float32(n_elems)
    return (jnp.float32(loss_weight) * total).astype(pred.dtype)


# ----------------------------- demo / check -------------------------------- #

def _check_case(pred, target, loss_weight):
    loss_mean = mse_loss_pallas(pred, target, loss_weight=loss_weight, reduction="mean")
    loss_sum = mse_loss_pallas(pred, target, loss_weight=loss_weight, reduction="sum")
    loss_none = mse_loss_pallas(pred, target, loss_weight=loss_weight, reduction="none")
    jax.block_until_ready((loss_mean, loss_sum, loss_none))

    ref_none = loss_weight * (pred - target) ** 2
    ref_mean = jnp.mean(ref_none, dtype=jnp.float32)
    ref_sum = jnp.sum(ref_none, dtype=jnp.float32)
    assert jnp.allclose(loss_mean, ref_mean, rtol=1e-5, atol=1e-5), (loss_mean, ref_mean)
    assert jnp.allclose(loss_sum, ref_sum, rtol=1e-5, atol=1e-3), (loss_sum, ref_sum)
    assert jnp.allclose(loss_none, ref_none, rtol=1e-5, atol=1e-5)
    assert loss_none.shape == pred.shape
    assert loss_none.dtype == pred.dtype


if __name__ == "__main__":
    key = jax.random.PRNGKey(0)
    k1, k2, k3, k4, k5, k6 = jax.random.split(key, 6)
    loss_weight = 1.0

    # 1) Small NCHW shape from the module docstring (plain-JAX fast path).
    pred_s = jax.random.normal(k1, (2, 4, 16, 16), dtype=jnp.float32)
    target_s = jax.random.normal(k2, (2, 4, 16, 16), dtype=jnp.float32)
    _check_case(pred_s, target_s, loss_weight)

    # 2) Lane-aligned NCHW tensor that exercises the Pallas path (4 grid steps,
    #    no tail mask).
    pred_m = jax.random.normal(k3, (2, 4, 32, 128), dtype=jnp.float32)
    target_m = jax.random.normal(k4, (2, 4, 32, 128), dtype=jnp.float32)
    _check_case(pred_m, target_m, loss_weight)

    # 3) Ragged NCHW tensor exercising lane padding + last-block tail masking.
    pred_r = jax.random.normal(k5, (2, 4, 33, 100), dtype=jnp.float32)
    target_r = jax.random.normal(k6, (2, 4, 33, 100), dtype=jnp.float32)
    _check_case(pred_r, target_r, loss_weight)

    print("KERNEL_OK")
</pallas_src>

<mosaic_0001>
module attributes {stable_mosaic.version = 11 : i64} {
  func.func @_mse_partial_kernel(%arg0: i32, %arg1: memref<64x128xf32, #tpu.memory_space<vmem>>, %arg2: memref<64x128xf32, #tpu.memory_space<vmem>>, %arg3: memref<8x128xf32, #tpu.memory_space<vmem>>) attributes {dimension_semantics = [#tpu.dimension_semantics<parallel>], iteration_bounds = array<i64: 4>, scalar_prefetch = 0 : i64, scratch_operands = 0 : i64, tpu.core_type = #tpu.core_type<tc>, window_params = [{transform_indices = @transform_0, window_bounds = array<i64: 64, 128>}, {transform_indices = @transform_1, window_bounds = array<i64: 64, 128>}, {transform_indices = @transform_2, window_bounds = array<i64: 8, 128>}]} {
    %c0 = arith.constant 0 : index
    %c0_0 = arith.constant 0 : index
    %0 = vector.load %arg1[%c0, %c0_0] : memref<64x128xf32, #tpu.memory_space<vmem>>, vector<64x128xf32>
    %c0_1 = arith.constant 0 : index
    %c0_2 = arith.constant 0 : index
    %1 = vector.load %arg2[%c0_1, %c0_2] : memref<64x128xf32, #tpu.memory_space<vmem>>, vector<64x128xf32>
    %2 = arith.subf %0, %1 : vector<64x128xf32>
    %3 = arith.mulf %2, %2 : vector<64x128xf32>
    %4 = vector.shape_cast %3 : vector<64x128xf32> to vector<8x8x128xf32>
    %cst = arith.constant dense<0.000000e+00> : vector<8x128xf32>
    %5 = vector.multi_reduction <add>, %4, %cst [0] : vector<8x8x128xf32> to vector<8x128xf32>
    %c0_3 = arith.constant 0 : index
    %c0_4 = arith.constant 0 : index
    %6 = vector.load %arg3[%c0_3, %c0_4] : memref<8x128xf32, #tpu.memory_space<vmem>>, vector<8x128xf32>
    tpu.vector_store %arg3[%c0_3, %c0_4], %5 {strides = array<i32>} : memref<8x128xf32, #tpu.memory_space<vmem>>, vector<8x128xf32>,
    return
  }
  func.func @transform_0(%arg0: i32) -> (i32, i32) {
    %c0_i32 = arith.constant 0 : i32
    %c0_i32_0 = arith.constant 0 : i32
    return %arg0, %c0_i32 : i32, i32
  }
  func.func @transform_1(%arg0: i32) -> (i32, i32) {
    %c0_i32 = arith.constant 0 : i32
    %c0_i32_0 = arith.constant 0 : i32
    return %arg0, %c0_i32 : i32, i32
  }
  func.func @transform_2(%arg0: i32) -> (i32, i32) {
    %c0_i32 = arith.constant 0 : i32
    %c0_i32_0 = arith.constant 0 : i32
    return %arg0, %c0_i32 : i32, i32
  }
}

</mosaic_0001>

<bundles_post_ra>
// kernel: tpu_custom_call.1
= control target key start
LH: loop header
LB: loop body
LE: loop exit
PB: predicated region body
PF: predicated region fallthrough
CT: control target
= control target key end

     0   :  { %7 = vsyncpa [#allocation3], 0  ;;  %s805_s0 = inlined_call_operand.hbm [shape: f32[256,128], index: 0, kind: input, shape index: {}]   ;;  %s806_s1 = inlined_call_operand.hbm [shape: f32[256,128], index: 1, kind: input, shape index: {}]   ;;  %s807_s2 = inlined_call_operand.hbm [shape: f32[32,128], index: 2, kind: output, shape index: {}]  }
   0x1   :  { %9 = vsyncpa [#allocation3 + $0x1], 0 }
   0x2   :  { %10 = vsyncpa [#allocation6], 0 }
   0x3   :  { %12 = vsyncpa [#allocation6 + $0x1], 0 }
   0x4   :  { %13 = vsyncpa [#allocation4], 0 }
   0x5   :  { %15 = vsyncpa [#allocation4 + $0x1], 0  ;;  %s575_s9 = smov 0   ;;  %s577_s10 = smov 0  }
   0x6   :  { %s579_s11 = smov 0   ;;  %s581_s12 = smov 0  }
   0x7 LB: > { %s596_s13 = sadd.s32 4294967295, %s553_s12   ;;  %s351_s14 = sadd.s32 4294967294, %s553_s12   ;;  %s553_s12 = sphi %s581_s12, %s822_s12   ;;  %s549_s11 = sphi %s579_s11, %s821_s11   ;;  %s545_s10 = sphi %s577_s10, %s820_s10   ;;  %s541_s9 = sphi %s575_s9, %s819_s9  }
   0x8   : > { %s600_s15 = sadd.s32 1, %s553_s12   ;;  %s28_s16 = sadd.s32 1, %s549_s11 }
   0x9   : > { %s25_s17 = ssub.s32 %s553_s12, %s600_s15  ;;  %p35_p0 = scmp.ne.s32.totalorder %s549_s11, %s545_s10 }
   0xa   : > { %p26_p1 = scmp.eq.s32.totalorder %s25_s17, 0  ;;  %p36_p2 = scmp.eq.s32.totalorder %s553_s12, 0 }
   0xb   : > { %p41_p3 = scmp.ne.s32.totalorder %s545_s10, %s541_s9  ;;  %p42_p4 = scmp.eq.s32.totalorder %s596_s13, 0 }
   0xc   : > { %s612_s18 = scalar_select %p26_p1, %s549_s11, %s28_s16  }
   0xd   : > { %p614_p5 = por %p36_p2, %p35_p0  ;;  %p618_p6 = por %p42_p4, %p41_p3 }
   0xe   : > { %p91_p7 = scmp.eq.s32.totalorder %s596_s13, 3  ;;  %p97_p8 = scmp.eq.s32.totalorder %s351_s14, 3 }
   0xf   : > { %s811_s20 = scalar_select %p618_p6, 1, 0 }
  0x10   : > { %p387_p9 = scmp.lt.s32.totalorder %s553_s12, 4  ;;  %p624_p10 = por %p91_p7, %p35_p0 }
  0x11   : > { %p628_p11 = por %p97_p8, %p41_p3  ;;  %s633_s23 = sand.u32 1, %s549_s11  }
  0x12   : > { %s812_s21 = scalar_select %p624_p10, 1, 0 }
  0x13   : > { %s813_s22 = scalar_select %p628_p11, 1, 0 }
  0x14   : > { %s368_s24 = sshll.u32 %s553_s12, 10  ;;  %s354_s25 = sshll.u32 %s633_s23, 6 }
  0x15   : > { %s642_s28 = scalar_lea.hbm %s805_s0, %s368_s24  ;;  %s121_s29 = scalar_lea.vmem [#allocation2], %s354_s25 }
  0x16   : > { %s128_s30 = sshll.u32 %s121_s29, 4  ;;  %p648_p12 = pnand %p387_p9, %p614_p5  ;;  %s652_s30 = int_to_ptr.vmem [resolvable:$true] %s128_s30 }
  0x17   : > { %s118_s4 = scalar_lea.sflag [#allocation3], %s633_s23  ;;  %s423_s5 = scalar_lea.hbm %s642_s28, 1024 }
  0x18   : > { %p424_p13 = scmp.ne.s32.totalorder %s642_s28, %s423_s5  ;;  %p425_p0 = pneg %p648_p12 }
  0x19   : > { %s428_s8 = scalar_lea.hbm %s805_s0, 4096  ;;  %p429_p3 = scmp.lt.u32.totalorder %s642_s28, %s805_s0 }
  0x1a   : > { %p426_p1 = pnand %p425_p0, %p424_p13  ;;  %p430_p4 = scmp.lt.u32.totalorder %s428_s8, %s423_s5 }
  0x1b   : > { %p432_p7 = scmp.lt.u32.totalorder %s423_s5, %s642_s28 }
  0x1c   : > { %p427_p2 = pneg %p426_p1  ;;  %p431_p5 = por %p430_p4, %p429_p3 }
  0x1e   : > { %p433_p8 = por %p432_p7, %p431_p5 }
  0x20   : > { %p434_p9 = pnand %p433_p8, %p427_p2 }
  0x22   : > { %437 = shalt.err (!%p434_p9)
}
  0x23   : > { %s438_s17 = scalar_lea.vmem %s652_s30, 1024  ;;  %s555_s19 = smov [#allocation2]  }
  0x24   : > { %p439_p13 = scmp.ne.s32.totalorder %s652_s30, %s438_s17  ;;  %s443_s26 = sshll.u32 %s555_s19, 4  ;;  %s444_s26 = int_to_ptr.vmem [resolvable:$false] %s443_s26 }
  0x25   : > { %s445_s27 = scalar_lea.vmem %s444_s26, 2048  ;;  %p446_p10 = scmp.lt.s32.totalorder %s652_s30, %s444_s26 }
  0x26   : > { %p441_p1 = pnand %p439_p13, %p425_p0  ;;  %p447_p3 = scmp.lt.s32.totalorder %s445_s27, %s438_s17 }
  0x28   : > { %p442_p11 = pneg %p441_p1  ;;  %p448_p4 = por %p447_p3, %p446_p10 }
  0x2a   : > { %p449_p5 = pnand %p448_p4, %p442_p11 }
  0x2c   : > { %452 = shalt.err (!%p449_p5)
}
  0x2d   : > { %s556_s29 = smov 128   ;;  %s557_s5 = smov 8  }
  0x2e   : > { %379 = dma.hbm_to_vmem [thread:$0]  (!%p648_p12), %s642_s28, 1024, %s652_s30, %s118_s4, %s556_s29, %s556_s29, %s557_s5  }
  0x2f   : > { %p360_p10 = scmp.ge.s32.totalorder %s553_s12, 1  ;;  %p157_p11 = scmp.lt.s32.totalorder %s553_s12, 5 }
  0x30   : > { %s696_s14 = scalar_lea.hbm %s806_s1, %s368_s24  ;;  %s142_s16 = scalar_lea.vmem [#allocation5], %s354_s25 }
  0x31   : > { %p687_p2 = pnand %p360_p10, %p157_p11  ;;  %s149_s17 = sshll.u32 %s142_s16, 4  ;;  %s700_s17 = int_to_ptr.vmem [resolvable:$true] %s149_s17 }
  0x32   : > { %s139_s28 = scalar_lea.sflag [#allocation6], %s633_s23  ;;  %s453_s30 = scalar_lea.hbm %s696_s14, 1024 }
  0x33   : > { %p454_p7 = scmp.ne.s32.totalorder %s696_s14, %s453_s30  ;;  %s458_s24 = scalar_lea.hbm %s806_s1, 4096 }
  0x34   : > { %p459_p13 = scmp.lt.u32.totalorder %s696_s14, %s806_s1  ;;  %p460_p1 = scmp.lt.u32.totalorder %s458_s24, %s453_s30 }
  0x35   : > { %p456_p8 = pnand %p454_p7, %p425_p0  ;;  %p462_p4 = scmp.lt.u32.totalorder %s453_s30, %s696_s14 }
  0x36   : > { %p461_p3 = por %p460_p1, %p459_p13 }
  0x37   : > { %p457_p9 = pneg %p456_p8 }
  0x38   : > { %p463_p5 = por %p462_p4, %p461_p3 }
  0x3a   : > { %p464_p10 = pnand %p463_p5, %p457_p9 }
  0x3c   : > { %467 = shalt.err (!%p464_p10)
}
  0x3d   : > { %s468_s25 = scalar_lea.vmem %s700_s17, 1024  ;;  %s558_s7 = smov [#allocation5]  }
  0x3e   : > { %p469_p11 = scmp.ne.s32.totalorder %s700_s17, %s468_s25  ;;  %s473_s8 = sshll.u32 %s558_s7, 4  ;;  %s474_s8 = int_to_ptr.vmem [resolvable:$false] %s473_s8 }
  0x3f   : > { %s475_s16 = scalar_lea.vmem %s474_s8, 2048  ;;  %p476_p6 = scmp.lt.s32.totalorder %s700_s17, %s474_s8 }
  0x40   : > { %p471_p7 = pnand %p469_p11, %p425_p0  ;;  %p477_p13 = scmp.lt.s32.totalorder %s475_s16, %s468_s25 }
  0x42   : > { %p472_p8 = pneg %p471_p7  ;;  %p478_p1 = por %p477_p13, %p476_p6 }
  0x44   : > { %p479_p3 = pnand %p478_p1, %p472_p8 }
  0x46   : > { %482 = shalt.err (!%p479_p3)
}
  0x47   : > { %382 = dma.hbm_to_vmem [thread:$0]  (!%p648_p12), %s696_s14, 1024, %s700_s17, %s139_s28, %s556_s29, %s556_s29, %s557_s5  }
  0x48   : > { %161 = sbr.rel (%p687_p2) target bundleno = 117 (0x75), region = 28  ;;  %s734_s30 = sand.u32 (!%p687_p2), 1, %s545_s10  }
  0x49   : > { %s361_s4 = sshll.u32 (!%p687_p2), %s734_s30, 6  ;;  %s164_s19 = scalar_lea.sflag (!%p687_p2), [#allocation3], %s734_s30 }
  0x4a   : > { %s738_s3 = scalar_lea.vmem (!%p687_p2), [#allocation2], %s361_s4  ;;  %p816_p6 = scmp.ne.s32.totalorder (!%p687_p2), %s811_s20, 0 }
  0x4f   : > { %528 = dma.done.wait (%p816_p6), %s164_s19, 1024  }
  0x50   : > { %530 = vsyncadd (%p816_p6), %s164_s19, 4294966272  ;;  %s173_s23 = scalar_lea.sflag [#allocation6], %s734_s30  ;;  %s176_s29 = scalar_lea.vmem [#allocation5], %s361_s4 }
  0x51   : > { %532 = dma.done.wait (%p816_p6), %s173_s23, 1024  }
  0x52   : > { %534 = vsyncadd (%p816_p6), %s173_s23, 4294966272  ;;  %v204_v0 = vld [vmem:[%s738_s3] sm:$0xff]  ;;  %v205_v1 = vld [vmem:[%s738_s3 + $0x8] sm:$0xff]  ;;  %s363_s20 = sshll.u32 %s734_s30, 3  ;;  %s365_s14 = sshll.u32 %s596_s13, 7 }
  0x53   : > { %v206_v2 = vld [vmem:[%s738_s3 + $0x10] sm:$0xff]  ;;  %v207_v3 = vld [vmem:[%s738_s3 + $0x18] sm:$0xff]  ;;  %v208_v4 = vld [vmem:[%s738_s3 + $0x20] sm:$0xff]  ;;  %s201_s5 = scalar_lea.vmem [#allocation7], %s363_s20  ;;  %s764_s24 = scalar_lea.hbm %s807_s2, %s365_s14 }
  0x54   : > { %v212_v5 = vld [vmem:[%s176_s29] sm:$0xff]  ;;  %v213_v6 = vld [vmem:[%s176_s29 + $0x8] sm:$0xff]  ;;  %v214_v7 = vld [vmem:[%s176_s29 + $0x10] sm:$0xff]  ;;  %s258_s6 = sshll.u32 %s201_s5, 4  ;;  %s245_s26 = scalar_lea.sflag [#allocation4], %s734_s30  ;;  %s759_s6 = int_to_ptr.vmem [resolvable:$true] %s258_s6 }
  0x55   : > { %v215_v8 = vld [vmem:[%s176_s29 + $0x18] sm:$0xff]  ;;  %v220_v9 = vsub.f32 %v204_v0, %v212_v5  ;;  %v216_v10 = vld [vmem:[%s176_s29 + $0x20] sm:$0xff]  ;;  %v221_v11 = vsub.f32 %v205_v1, %v213_v6  ;;  %v222_v12 = vsub.f32 %v206_v2, %v214_v7  ;;  %v209_v14 = vld [vmem:[%s738_s3 + $0x28] sm:$0xff]  ;;  %s483_s27 = scalar_lea.vmem %s759_s6, 128  ;;  %p817_p0 = scmp.ne.s32.totalorder %s812_s21, 0 }
  0x56   : > { %v223_v13 = vsub.f32 %v207_v3, %v215_v8  ;;  %v217_v15 = vld [vmem:[%s176_s29 + $0x28] sm:$0xff]  ;;  %v224_v17 = vsub.f32 %v208_v4, %v216_v10  ;;  %v210_v20 = vld [vmem:[%s738_s3 + $0x30] sm:$0xff]  ;;  %v211_v25 = vld [vmem:[%s738_s3 + $0x38] sm:$0xff]  ;;  %p484_p12 = scmp.ne.s32.totalorder %s759_s6, %s483_s27  ;;  %s559_s13 = smov [#allocation7]  }
  0x57   : > { %v228_v16 = vmul.f32 %v220_v9, %v220_v9  ;;  %v229_v18 = vmul.f32 %v221_v11, %v221_v11  ;;  %v230_v19 = vmul.f32 %v222_v12, %v222_v12  ;;  %v218_v21 = vld [vmem:[%s176_s29 + $0x30] sm:$0xff]  ;;  %v225_v22 = vsub.f32 %v209_v14, %v217_v15  ;;  %v219_v26 = vld [vmem:[%s176_s29 + $0x38] sm:$0xff]  ;;  %s487_s25 = sshll.u32 %s559_s13, 4  ;;  %s488_s25 = int_to_ptr.vmem [resolvable:$false] %s487_s25 }
  0x58   : > { %v231_v23 = vmul.f32 %v223_v13, %v223_v13  ;;  %v226_v27 = vsub.f32 %v210_v20, %v218_v21  ;;  %v232_v28 = vmul.f32 %v224_v17, %v224_v17  ;;  %v227_v30 = vsub.f32 %v211_v25, %v219_v26  ;;  %p485_p2 = pnand %p484_p12, %p817_p0  ;;  %s489_s7 = scalar_lea.vmem %s488_s25, 256 }
  0x59   : > { %v236_v24 = vadd.f32 %v229_v18, %v228_v16  ;;  %v233_v31 = vmul.f32 %v225_v22, %v225_v22  ;;  %p490_p4 = scmp.lt.s32.totalorder %s759_s6, %s488_s25  ;;  %p491_p5 = scmp.lt.s32.totalorder %s489_s7, %s483_s27 }
  0x5a   : > { %v234_v33 = vmul.f32 %v226_v27, %v226_v27  ;;  %v235_v35 = vmul.f32 %v227_v30, %v227_v30  ;;  %p486_p9 = pneg %p485_p2 }
  0x5b   : > { %v237_v29 = vadd.f32 %v236_v24, %v230_v19  ;;  %p492_p10 = por %p491_p5, %p490_p4 }
  0x5d   : > { %v238_v32 = vadd.f32 %v237_v29, %v231_v23  ;;  %p493_p11 = pnand %p492_p10, %p486_p9 }
  0x5f   : > { %v239_v34 = vadd.f32 %v238_v32, %v232_v28 }
  0x61   : > { %v240_v36 = vadd.f32 %v239_v34, %v233_v31 }
  0x63   : > { %v241_v37 = vadd.f32 %v240_v36, %v234_v33 }
  0x65   : > { %v242_v38 = vadd.f32 %v241_v37, %v235_v35 }
  0x67   : > { %243 = vst [vmem:[%s201_s5] sm:$0xff] %v242_v38 }
  0x68   : > { %496 = shalt.err (!%p493_p11)
}
  0x69   : > { %s497_s8 = scalar_lea.hbm %s764_s24, 128  ;;  %s501_s4 = scalar_lea.hbm %s807_s2, 512 }
  0x6a   : > { %p498_p7 = scmp.ne.s32.totalorder %s764_s24, %s497_s8  ;;  %p502_p1 = scmp.lt.u32.totalorder %s764_s24, %s807_s2 }
  0x6b   : > { %p503_p3 = scmp.lt.u32.totalorder %s501_s4, %s497_s8  ;;  %p505_p12 = scmp.lt.u32.totalorder %s497_s8, %s764_s24 }
  0x6c   : > { %p499_p8 = pnand %p498_p7, %p817_p0 }
  0x6d   : > { %p504_p6 = por %p503_p3, %p502_p1 }
  0x6e   : > { %p500_p13 = pneg %p499_p8 }
  0x6f   : > { %p506_p2 = por %p505_p12, %p504_p6 }
  0x71   : > { %p507_p9 = pnand %p506_p2, %p500_p13 }
  0x73   : > { %510 = shalt.err (!%p507_p9)
}
  0x74   : > { %374 = dma.vmem_to_hbm [thread:$0]  (%p817_p0), %s759_s6, 128, %s764_s24, %s245_s26  }
  0x75 PF: > { %p388_p4 = scmp.ge.s32.totalorder %s553_s12, 2  ;;  %s270_s23 = sand.u32 1, %s541_s9  }
  0x76   : > { %p818_p5 = scmp.ne.s32.totalorder %s813_s22, 0  ;;  %s271_s29 = scalar_lea.sflag [#allocation4], %s270_s23 }
  0x78   : > { %p384_p10 = pnand %p388_p4, %p818_p5 }
  0x7a   : > { %536 = dma.done.wait (!%p384_p10), %s271_s29, 128  }
  0x7b   : > { %538 = vsyncadd (!%p384_p10), %s271_s29, 4294967168  ;;  %p18_p11 = scmp.ge.s32.totalorder %s600_s15, 6   ;;  %s819_s9 = smov %s545_s10 }
  0x7c   : > { %s820_s10 = smov %s549_s11  ;;  %s821_s11 = smov %s612_s18 }
  0x7d   : > { %s822_s12 = smov %s600_s15  ;;  %20 = sbr.rel (!%p18_p11) target bundleno = 7 (0x7), region = 86 }
  0x84   :  { %276 = vsyncpa [#allocation3], 1 }
  0x85   :  { %278 = vsyncpa [#allocation3 + $0x1], 1 }
  0x86   :  { %279 = vsyncpa [#allocation6], 1 }
  0x87   :  { %281 = vsyncpa [#allocation6 + $0x1], 1 }
  0x88   :  { %282 = vsyncpa [#allocation4], 1 }
  0x89   :  { %284 = vsyncpa [#allocation4 + $0x1], 1 }

</bundles_post_ra>
